<compile_context>
chip_gen: v6e
topology: v6e:2x2x1
jax: 0.10.0
libtpu: 0.0.40
codegen_flags: <defaults>
</compile_context>

<pallas_src>
import functools

import jax
import jax.numpy as jnp
from jax.experimental import pallas as pl
from jax.experimental.pallas import tpu as pltpu


# ----------------------------------------------------------------------- device heuristics
def _device_kind():
    try:
        return jax.devices()[0].device_kind.lower()
    except Exception:
        return ""


def _vmem_capacity_bytes():
    try:
        cap = int(pltpu.get_tpu_info().vmem_capacity_bytes)
        if cap > 0:
            return cap
    except Exception:
        pass
    kind = _device_kind()
    small = ("v7" in kind) or ("7x" in kind)
    return (64 if small else 128) * 1024 * 1024


def _supports_bf16_vpu(kind):
    # v2-v5 have no bf16 VALU path; keep elementwise math in f32 there.
    return not any(tag in kind for tag in ("v2", "v3", "v4", "v5"))


def _ceil_to(v, m):
    return -(-v // m) * m


def _pick_block_rows(n, requested, vmem_cap):
    # Cap the dst-node block so (a) double-buffered edge blocks + intermediates fit VMEM
    # on every generation (v7x: 64 MiB) and (b) the grid has >= 2 (ideally >= 4) steps.
    max_blk = 256 if vmem_cap <= 64 * 1024 * 1024 else 512
    blk = requested if requested is not None else max(n // 4, 8)
    blk = max(8, min(blk, max_blk, _ceil_to(n, 8)))
    return _ceil_to(blk, 8)


# ----------------------------------------------------------------------------- kernel
def egnn_block_kernel(x_ref, pos_ref, ein_ref, pv_ref, agge_ref,
                      w1se_ref, w1dst_ref, b1c_ref, w2c_ref, b2c_ref,
                      nw1x_ref, nw1e_ref, nb1_ref, nw2_ref, nb2_ref,
                      newx_ref, newpos_ref, *, kp, inv_k, ew_dtype):
    f32 = jnp.float32
    bf16 = jnp.bfloat16
    blk = x_ref.shape[0]
    h_dim = w1se_ref.shape[1]

    x_bf = x_ref[...].astype(bf16)          # (BLK, D)
    pos = pos_ref[...]                      # (BLK, 3)  f32

    # ---- coord_net: Linear(2D+Ed+1, H) + ReLU + Linear(H, 1) -----------------------
    # Per-edge part [x[src], edge_attr, rdist] @ W1 in one fused bf16 MXU matmul.
    # rdist was precomputed in the wrapper and folded in as one extra column, so the
    # lane-sparse rel / rel*rel / sqrt work never runs on the VALU here.
    h_edge = jnp.dot(ein_ref[...], w1se_ref[...], preferred_element_type=f32)   # (BLK*Kp, H)
    # x[dst] part is constant within each K-group: compute per node and broadcast over
    # K; the first-layer bias is folded in here (one (BLK,H) add, not (BLK,K,H)).
    h_dst = (jnp.dot(x_bf, w1dst_ref[...], preferred_element_type=f32)
             + b1c_ref[...])                                                     # (BLK, H)

    # Elementwise h-path in bf16 on v6e/v7x (halves VALU vregs + VMEM), f32 on v5e.
    h = (h_edge.reshape(blk, kp, h_dim).astype(ew_dtype)
         + h_dst[:, None, :].astype(ew_dtype))
    h = jnp.maximum(h, 0.0).astype(bf16)                                         # (BLK, Kp, H)

    # Second coord linear (H -> 1) on the MXU (it has plenty of slack) instead of a
    # VPU multiply + XLU lane reduction; f32 accumulation.
    cw = (jnp.dot(h.reshape(blk * kp, h_dim), w2c_ref[...],
                  preferred_element_type=f32)
          + b2c_ref[...])                                                        # (BLK*Kp, 1)

    # scatter_mean(cw * rel * valid, dst) with `rel` never materialized:
    #   sum_k cw*valid*(pos - psrc) = pos * sum_k(cw*valid) - sum_k(cw*valid*psrc).
    # pv packs [psrc*valid, valid], so one multiply + one sublane reduce gives both
    # sums; padded / masked edges contribute exactly 0.
    spv = jnp.sum(cw.reshape(blk, kp, 1) * pv_ref[...], axis=1)                  # (BLK, 4)
    newpos_ref[...] = pos + (pos * spv[:, 3:4] - spv[:, 0:3]) * inv_k

    # ---- node_net: Linear(D+Ed, H) + ReLU + Linear(H, D) ---------------------------
    h2 = (jnp.dot(x_bf, nw1x_ref[...], preferred_element_type=f32)
          + jnp.dot(agge_ref[...].astype(bf16), nw1e_ref[...], preferred_element_type=f32)
          + nb1_ref[...])
    h2 = jnp.maximum(h2, 0.0)
    newx_ref[...] = (jnp.dot(h2.astype(bf16), nw2_ref[...], preferred_element_type=f32)
                     + nb2_ref[...])


# ----------------------------------------------------------------------------- per-layer wrapper
def _egnn_layer_pallas(x, pos, src_f, ea_flat_bf, valid_p, agg_edge, p, *,
                       blk, kp, k_real, ew_dtype, vmem_limit):
    f32, bf16 = jnp.float32, jnp.bfloat16
    Np, D = x.shape
    Ed = ea_flat_bf.shape[-1]
    H = p["cb1"].shape[-1]
    grid = (Np // blk,)

    # Per-layer gathers + geometry in plain JAX (O(NE) work, no one-hot matmuls).
    x_src = jnp.take(x, src_f, axis=0).astype(bf16)                       # (Np*Kp, D)
    p_src = jnp.take(pos, src_f, axis=0).reshape(Np, kp, 3)               # (Np, Kp, 3)
    rdist = jnp.sqrt(jnp.sum((pos[:, None, :] - p_src) ** 2, axis=-1, keepdims=True))
    ein = jnp.concatenate([x_src, ea_flat_bf, rdist.reshape(-1, 1).astype(bf16)],
                          axis=-1)                                        # (Np*Kp, D+Ed+1)
    pv = jnp.concatenate([p_src, jnp.ones_like(rdist)], axis=-1) * valid_p  # (Np, Kp, 4)

    # Repack weights along the torch.cat([x[src], x[dst], edge_attr, rdist]) order.
    cw1, cb1, cw2, cb2 = p["cw1"], p["cb1"], p["cw2"], p["cb2"]
    nw1, nb1, nw2, nb2 = p["nw1"], p["nb1"], p["nw2"], p["nb2"]
    w1se = jnp.concatenate([cw1[:D], cw1[2 * D:]], axis=0).astype(bf16)   # (D+Ed+1, H)
    w1dst = cw1[D:2 * D].astype(bf16)                                     # (D, H)
    w2col = cw2.astype(bf16)                                              # (H, 1)
    nw1x = nw1[:D].astype(bf16)
    nw1e = nw1[D:].astype(bf16)
    nw2b = nw2.astype(bf16)

    inputs = (x, pos, ein, pv, agg_edge,
              w1se, w1dst, cb1, w2col, cb2, nw1x, nw1e, nb1, nw2b, nb2)

    node2 = lambda i: (i, 0)
    edge2 = lambda i: (i, 0)
    edge3 = lambda i: (i, 0, 0)
    full2 = lambda i: (0, 0)
    in_specs = [
        pl.BlockSpec((blk, D), node2),                 # x (f32)
        pl.BlockSpec((blk, 3), node2),                 # pos
        pl.BlockSpec((blk * kp, D + Ed + 1), edge2),   # [x_src, edge_attr, rdist]  bf16
        pl.BlockSpec((blk, kp, 4), edge3),             # [psrc*valid, valid]
        pl.BlockSpec((blk, Ed), node2),                # agg_edge (layer-invariant)
        pl.BlockSpec((D + Ed + 1, H), full2),          # coord W1 (src+edge+rdist rows)
        pl.BlockSpec((D, H), full2),                   # coord W1 (dst rows)
        pl.BlockSpec((1, H), full2),                   # coord b1
        pl.BlockSpec((H, 1), full2),                   # coord W2 (column)
        pl.BlockSpec((1, 1), full2),                   # coord b2
        pl.BlockSpec((D, H), full2),                   # node W1 (x rows)
        pl.BlockSpec((Ed, H), full2),                  # node W1 (agg_edge rows)
        pl.BlockSpec((1, H), full2),                   # node b1
        pl.BlockSpec((H, D), full2),                   # node W2
        pl.BlockSpec((1, D), full2),                   # node b2
    ]
    out_specs = (pl.BlockSpec((blk, D), node2),
                 pl.BlockSpec((blk, 3), node2))

    NE = Np * kp
    flops = int(2 * NE * (D + Ed + 1) * H      # coord first linear, per-edge part
                + 2 * Np * D * H               # coord first linear, dst part
                + 2 * NE * H                   # coord second linear (H -> 1)
                + 2 * Np * (D + Ed) * H        # node first linear
                + 2 * Np * H * D)              # node second linear
    bytes_accessed = int(sum(a.size * a.dtype.itemsize for a in inputs)
                         + Np * (D + 3) * 4)

    kernel = functools.partial(egnn_block_kernel, kp=kp, inv_k=1.0 / k_real,
                               ew_dtype=ew_dtype)
    new_x, new_pos = pl.pallas_call(
        kernel,
        grid=grid,
        in_specs=in_specs,
        out_specs=out_specs,
        out_shape=(jax.ShapeDtypeStruct((Np, D), f32),
                   jax.ShapeDtypeStruct((Np, 3), f32)),
        compiler_params=pltpu.CompilerParams(
            dimension_semantics=("parallel",),        # lets the 2 TCs on v7x split blocks
            vmem_limit_bytes=vmem_limit),
        cost_estimate=pl.CostEstimate(flops=flops, transcendentals=0,
                                      bytes_accessed=bytes_accessed),
    )(*inputs)
    return new_x, new_pos


# ----------------------------------------------------------------------------- glue
def _build_graph(t, pair_feat, mask_res, k):
    """kNN graph (plain JAX): dst-major edges, exactly K = min(k, L-1) per node."""
    B, L = mask_res.shape
    P = pair_feat.shape[-1]
    N = B * L
    K = min(k, L - 1)

    pos = t.reshape(N, 3).astype(jnp.float32)
    mask = mask_res.reshape(N)
    batch_idx = jnp.repeat(jnp.arange(B), L)

    d2 = jnp.sum((pos[:, None, :] - pos[None, :, :]) ** 2, axis=-1)
    allowed = (batch_idx[:, None] == batch_idx[None, :]) & ~jnp.eye(N, dtype=bool)
    d2 = jnp.where(allowed, d2, jnp.inf)
    _, src = jax.lax.top_k(-d2, K)                      # (N, K): src neighbours of dst n
    src_f = src.reshape(-1)
    dst_f = jnp.repeat(jnp.arange(N), K)
    NE = N * K

    # edge_pair_feat = pair_feat[batch[dst], src % L, dst % L]
    epf = pair_feat[batch_idx[:, None], src % L, (jnp.arange(N) % L)[:, None]]   # (N, K, P)
    rel0 = pos[src_f] - pos[dst_f]
    rdist0 = jnp.linalg.norm(rel0, axis=-1, keepdims=True)
    edge_attr = jnp.concatenate([epf.reshape(NE, P), rdist0], axis=-1)           # (NE, P+1)

    valid = (mask[src_f] & mask[dst_f]).astype(jnp.float32)[:, None]             # (NE, 1)
    return pos, src, edge_attr, valid, K


def gnn_encoder_forward(R, t, res_feat, pair_feat, mask_res, layer_params, k=30,
                        block_rows=None):
    f32, bf16 = jnp.float32, jnp.bfloat16
    B, L = mask_res.shape
    D = res_feat.shape[-1]
    N = B * L

    pos, src, edge_attr, valid, K = _build_graph(t, pair_feat, mask_res, k)
    Ed = edge_attr.shape[-1]
    x = res_feat.reshape(N, D).astype(f32)

    kind = _device_kind()
    vmem_cap = _vmem_capacity_bytes()
    BLK = _pick_block_rows(N, block_rows, vmem_cap)
    Kp = _ceil_to(K, 8)                    # tile-aligned K: reshapes / reductions stay free
    Np = _ceil_to(N, BLK)                  # pad N instead of falling back to BLK = N
    vmem_limit = min(96 * 1024 * 1024, (vmem_cap * 3) // 4)

    # Pad layer-invariant data once.  Padded edges/rows carry valid = 0 so they
    # contribute exactly 0 to every aggregation; padded src indices point at node 0
    # (harmless -- masked by valid and sliced off at the end).
    src_p = jnp.zeros((Np, Kp), jnp.int32).at[:N, :K].set(src.astype(jnp.int32))
    src_f = src_p.reshape(-1)
    valid_p = jnp.zeros((Np, Kp, 1), f32).at[:N, :K, :].set(valid.reshape(N, K, 1))
    ea_flat_bf = (jnp.zeros((Np, Kp, Ed), f32).at[:N, :K, :]
                  .set(edge_attr.reshape(N, K, Ed))
                  .reshape(Np * Kp, Ed).astype(bf16))
    # scatter_mean(edge_attr, dst) over the real K edges (unmasked, exactly like the
    # module's scatter_mean); layer-invariant, so hoisted out of the per-layer kernel.
    agg_p = jnp.zeros((Np, Ed), f32).at[:N].set(edge_attr.reshape(N, K, Ed).mean(axis=1))
    x_p = jnp.zeros((Np, D), f32).at[:N].set(x)
    pos_p = jnp.zeros((Np, 3), f32).at[:N].set(pos)

    ew_dtype = bf16 if _supports_bf16_vpu(kind) else f32
    for p in layer_params:
        x_p, pos_p = _egnn_layer_pallas(x_p, pos_p, src_f, ea_flat_bf, valid_p, agg_p, p,
                                        blk=BLK, kp=Kp, k_real=K, ew_dtype=ew_dtype,
                                        vmem_limit=vmem_limit)

    # TODO(synk): the surrounding GNNEncoder also builds new_R / new_t via
    # construct_3d_basis but never returns them (dead code); omitted here.
    return x_p[:N].reshape(B, L, D), pos_p[:N]


# ----------------------------------------------------------------------------- params
def _init_linear(key, fan_in, fan_out):
    kw, kb = jax.random.split(key)
    bound = 1.0 / (fan_in ** 0.5)
    w = jax.random.uniform(kw, (fan_in, fan_out), jnp.float32, -bound, bound)
    b = jax.random.uniform(kb, (1, fan_out), jnp.float32, -bound, bound)
    return w, b


def init_params(key, node_dim, edge_dim, num_layers, hidden=128):
    params = []
    for _ in range(num_layers):
        key, k1, k2, k3, k4 = jax.random.split(key, 5)
        cw1, cb1 = _init_linear(k1, 2 * node_dim + edge_dim + 1, hidden)
        cw2, cb2 = _init_linear(k2, hidden, 1)
        nw1, nb1 = _init_linear(k3, node_dim + edge_dim, hidden)
        nw2, nb2 = _init_linear(k4, hidden, node_dim)
        params.append(dict(cw1=cw1, cb1=cb1, cw2=cw2, cb2=cb2,
                           nw1=nw1, nb1=nb1, nw2=nw2, nb2=nb2))
    return params


# ----------------------------------------------------------------------------- reference (plain JAX)
def reference_forward(t, res_feat, pair_feat, mask_res, layer_params, k=30):
    B, L = mask_res.shape
    D = res_feat.shape[-1]
    N = B * L
    pos, src, edge_attr, valid, K = _build_graph(t, pair_feat, mask_res, k)
    x = res_feat.reshape(N, D).astype(jnp.float32)
    src_f = src.reshape(-1)
    dst_f = jnp.repeat(jnp.arange(N), K)
    hp = jax.lax.Precision.HIGHEST
    for p in layer_params:
        rel = pos[dst_f] - pos[src_f]
        rdist = jnp.linalg.norm(rel, axis=-1, keepdims=True)
        feat = jnp.concatenate([x[src_f], x[dst_f], edge_attr, rdist], axis=-1)
        h = jnp.maximum(jnp.dot(feat, p["cw1"], precision=hp) + p["cb1"], 0.0)
        cw = jnp.dot(h, p["cw2"], precision=hp) + p["cb2"]
        delta = cw * rel * valid
        agg_delta = jnp.zeros((N, 3), jnp.float32).at[dst_f].add(delta) / K
        new_pos = pos + agg_delta
        agg_edge = jnp.zeros((N, edge_attr.shape[-1]), jnp.float32).at[dst_f].add(edge_attr) / K
        nf = jnp.concatenate([x, agg_edge], axis=-1)
        h2 = jnp.maximum(jnp.dot(nf, p["nw1"], precision=hp) + p["nb1"], 0.0)
        x = jnp.dot(h2, p["nw2"], precision=hp) + p["nb2"]
        pos = new_pos
    return x.reshape(B, L, D), pos


# ----------------------------------------------------------------------------- main
if __name__ == "__main__":
    B, L = 2, 16
    NODE_FEAT_DIM = 32
    PAIR_FEAT_DIM = 8
    NUM_LAYERS = 2
    K_NN = 30                      # module hard-codes k=30; with L=16 this clamps to 15

    key = jax.random.PRNGKey(0)
    kR, kt, kres, kpair, kmask, kparam = jax.random.split(key, 6)
    R = jax.random.normal(kR, (B, L, 3, 3), jnp.float32)
    t = jax.random.normal(kt, (B, L, 3), jnp.float32) * 5.0
    res_feat = jax.random.normal(kres, (B, L, NODE_FEAT_DIM), jnp.float32)
    pair_feat = jax.random.normal(kpair, (B, L, L, PAIR_FEAT_DIM), jnp.float32)
    mask_res = jax.random.bernoulli(kmask, 0.85, (B, L))

    params = init_params(kparam, NODE_FEAT_DIM, PAIR_FEAT_DIM + 1, NUM_LAYERS)

    out_x, out_pos = gnn_encoder_forward(R, t, res_feat, pair_feat, mask_res, params,
                                         k=K_NN, block_rows=8)   # 4 dst-blocks -> pipelined grid
    out_x = jax.block_until_ready(out_x)
    out_pos = jax.block_until_ready(out_pos)
    assert out_x.shape == (B, L, NODE_FEAT_DIM), out_x.shape

    ref_x, ref_pos = reference_forward(t, res_feat, pair_feat, mask_res, params, k=K_NN)
    ref_x = jax.block_until_ready(ref_x)
    err_x = float(jnp.max(jnp.abs(out_x - ref_x)))
    err_pos = float(jnp.max(jnp.abs(out_pos - ref_pos)))
    assert err_x < 5e-2, f"node-feature mismatch, max abs err = {err_x}"
    assert err_pos < 5e-1, f"coordinate mismatch, max abs err = {err_pos}"

    print("KERNEL_OK")
</pallas_src>

<mosaic_0001>
module attributes {stable_mosaic.version = 11 : i64} {
  func.func @egnn_block_kernel(%arg0: i32, %arg1: memref<8x32xf32, #tpu.memory_space<vmem>>, %arg2: memref<8x3xf32, #tpu.memory_space<vmem>>, %arg3: memref<128x42xbf16, #tpu.memory_space<vmem>>, %arg4: memref<8x16x4xf32, #tpu.memory_space<vmem>>, %arg5: memref<8x9xf32, #tpu.memory_space<vmem>>, %arg6: memref<42x128xbf16, #tpu.memory_space<vmem>>, %arg7: memref<32x128xbf16, #tpu.memory_space<vmem>>, %arg8: memref<1x128xf32, #tpu.memory_space<vmem>>, %arg9: memref<128x1xbf16, #tpu.memory_space<vmem>>, %arg10: memref<1x1xf32, #tpu.memory_space<vmem>>, %arg11: memref<32x128xbf16, #tpu.memory_space<vmem>>, %arg12: memref<9x128xbf16, #tpu.memory_space<vmem>>, %arg13: memref<1x128xf32, #tpu.memory_space<vmem>>, %arg14: memref<128x32xbf16, #tpu.memory_space<vmem>>, %arg15: memref<1x32xf32, #tpu.memory_space<vmem>>, %arg16: memref<8x32xf32, #tpu.memory_space<vmem>>, %arg17: memref<8x3xf32, #tpu.memory_space<vmem>>) attributes {dimension_semantics = [#tpu.dimension_semantics<parallel>], iteration_bounds = array<i64: 4>, scalar_prefetch = 0 : i64, scratch_operands = 0 : i64, tpu.core_type = #tpu.core_type<tc>, window_params = [{transform_indices = @transform_0, window_bounds = array<i64: 8, 32>}, {transform_indices = @transform_1, window_bounds = array<i64: 8, 3>}, {transform_indices = @transform_2, window_bounds = array<i64: 128, 42>}, {transform_indices = @transform_3, window_bounds = array<i64: 8, 16, 4>}, {transform_indices = @transform_4, window_bounds = array<i64: 8, 9>}, {pipeline_mode = #tpu.pipeline_mode<synchronous>, transform_indices = @transform_5, window_bounds = array<i64: 42, 128>}, {pipeline_mode = #tpu.pipeline_mode<synchronous>, transform_indices = @transform_6, window_bounds = array<i64: 32, 128>}, {pipeline_mode = #tpu.pipeline_mode<synchronous>, transform_indices = @transform_7, window_bounds = array<i64: 1, 128>}, {pipeline_mode = #tpu.pipeline_mode<synchronous>, transform_indices = @transform_8, window_bounds = array<i64: 128, 1>}, {pipeline_mode = #tpu.pipeline_mode<synchronous>, transform_indices = @transform_9, window_bounds = array<i64: 1, 1>}, {pipeline_mode = #tpu.pipeline_mode<synchronous>, transform_indices = @transform_10, window_bounds = array<i64: 32, 128>}, {pipeline_mode = #tpu.pipeline_mode<synchronous>, transform_indices = @transform_11, window_bounds = array<i64: 9, 128>}, {pipeline_mode = #tpu.pipeline_mode<synchronous>, transform_indices = @transform_12, window_bounds = array<i64: 1, 128>}, {pipeline_mode = #tpu.pipeline_mode<synchronous>, transform_indices = @transform_13, window_bounds = array<i64: 128, 32>}, {pipeline_mode = #tpu.pipeline_mode<synchronous>, transform_indices = @transform_14, window_bounds = array<i64: 1, 32>}, {transform_indices = @transform_15, window_bounds = array<i64: 8, 32>}, {transform_indices = @transform_16, window_bounds = array<i64: 8, 3>}]} {
    %c0 = arith.constant 0 : index
    %c0_0 = arith.constant 0 : index
    %0 = vector.load %arg1[%c0, %c0_0] : memref<8x32xf32, #tpu.memory_space<vmem>>, vector<8x32xf32>
    %1 = arith.truncf %0 : vector<8x32xf32> to vector<8x32xbf16>
    %c0_1 = arith.constant 0 : index
    %c0_2 = arith.constant 0 : index
    %2 = vector.load %arg2[%c0_1, %c0_2] : memref<8x3xf32, #tpu.memory_space<vmem>>, vector<8x3xf32>
    %c0_3 = arith.constant 0 : index
    %c0_4 = arith.constant 0 : index
    %3 = vector.load %arg3[%c0_3, %c0_4] : memref<128x42xbf16, #tpu.memory_space<vmem>>, vector<128x42xbf16>
    %c0_5 = arith.constant 0 : index
    %c0_6 = arith.constant 0 : index
    %4 = vector.load %arg6[%c0_5, %c0_6] : memref<42x128xbf16, #tpu.memory_space<vmem>>, vector<42x128xbf16>
    %cst = arith.constant dense<0.000000e+00> : vector<128x128xf32>
    %5 = tpu.matmul %3, %4, %cst {dimension_numbers = #tpu.dot_dimension_numbers<[1], [0], [0], [1], [0, 0, 1, 1], [], []>} : vector<128x42xbf16>, vector<42x128xbf16>, vector<128x128xf32> -> vector<128x128xf32>
    %c0_7 = arith.constant 0 : index
    %c0_8 = arith.constant 0 : index
    %6 = vector.load %arg7[%c0_7, %c0_8] : memref<32x128xbf16, #tpu.memory_space<vmem>>, vector<32x128xbf16>
    %cst_9 = arith.constant dense<0.000000e+00> : vector<8x128xf32>
    %7 = tpu.matmul %1, %6, %cst_9 {dimension_numbers = #tpu.dot_dimension_numbers<[1], [0], [0], [1], [0, 0, 1, 1], [], []>} : vector<8x32xbf16>, vector<32x128xbf16>, vector<8x128xf32> -> vector<8x128xf32>
    %c0_10 = arith.constant 0 : index
    %c0_11 = arith.constant 0 : index
    %8 = vector.load %arg8[%c0_10, %c0_11] : memref<1x128xf32, #tpu.memory_space<vmem>>, vector<1x128xf32>
    %9 = vector.broadcast %8 : vector<1x128xf32> to vector<8x128xf32>
    %10 = arith.addf %7, %9 : vector<8x128xf32>
    %11 = vector.shape_cast %5 : vector<128x128xf32> to vector<8x16x128xf32>
    %12 = arith.truncf %11 : vector<8x16x128xf32> to vector<8x16x128xbf16>
    %13 = vector.shape_cast %10 : vector<8x128xf32> to vector<8x1x128xf32>
    %14 = arith.truncf %13 : vector<8x1x128xf32> to vector<8x1x128xbf16>
    %15 = vector.broadcast %14 : vector<8x1x128xbf16> to vector<8x16x128xbf16>
    %16 = arith.addf %12, %15 : vector<8x16x128xbf16>
    %cst_12 = arith.constant 0.000000e+00 : bf16
    %17 = vector.broadcast %cst_12 : bf16 to vector<8x16x128xbf16>
    %18 = arith.maximumf %16, %17 : vector<8x16x128xbf16>
    %19 = vector.shape_cast %18 : vector<8x16x128xbf16> to vector<128x128xbf16>
    %c0_13 = arith.constant 0 : index
    %c0_14 = arith.constant 0 : index
    %20 = vector.load %arg9[%c0_13, %c0_14] : memref<128x1xbf16, #tpu.memory_space<vmem>>, vector<128x1xbf16>
    %cst_15 = arith.constant dense<0.000000e+00> : vector<128x1xf32>
    %21 = tpu.matmul %19, %20, %cst_15 {dimension_numbers = #tpu.dot_dimension_numbers<[1], [0], [0], [1], [0, 0, 1, 1], [], []>} : vector<128x128xbf16>, vector<128x1xbf16>, vector<128x1xf32> -> vector<128x1xf32>
    %c0_16 = arith.constant 0 : index
    %c0_17 = arith.constant 0 : index
    %22 = vector.load %arg10[%c0_16, %c0_17] : memref<1x1xf32, #tpu.memory_space<vmem>>, vector<1x1xf32>
    %23 = vector.broadcast %22 : vector<1x1xf32> to vector<128x1xf32>
    %24 = arith.addf %21, %23 : vector<128x1xf32>
    %25 = vector.shape_cast %24 : vector<128x1xf32> to vector<8x16x1xf32>
    %c0_18 = arith.constant 0 : index
    %c0_19 = arith.constant 0 : index
    %c0_20 = arith.constant 0 : index
    %26 = vector.load %arg4[%c0_18, %c0_19, %c0_20] : memref<8x16x4xf32, #tpu.memory_space<vmem>>, vector<8x16x4xf32>
    %27 = vector.broadcast %25 : vector<8x16x1xf32> to vector<8x16x4xf32>
    %28 = arith.mulf %27, %26 : vector<8x16x4xf32>
    %cst_21 = arith.constant dense<0.000000e+00> : vector<8x4xf32>
    %29 = vector.multi_reduction <add>, %28, %cst_21 [1] : vector<8x16x4xf32> to vector<8x4xf32>
    %30 = vector.extract_strided_slice %29 {offsets = [0, 3], sizes = [8, 1], strides = [1, 1]} : vector<8x4xf32> to vector<8x1xf32>
    %31 = vector.broadcast %30 : vector<8x1xf32> to vector<8x3xf32>
    %32 = arith.mulf %2, %31 : vector<8x3xf32>
    %33 = vector.extract_strided_slice %29 {offsets = [0, 0], sizes = [8, 3], strides = [1, 1]} : vector<8x4xf32> to vector<8x3xf32>
    %34 = arith.subf %32, %33 : vector<8x3xf32>
    %cst_22 = arith.constant 0.0666666701 : f32
    %35 = vector.broadcast %cst_22 : f32 to vector<8x3xf32>
    %36 = arith.mulf %34, %35 : vector<8x3xf32>
    %37 = arith.addf %2, %36 : vector<8x3xf32>
    %c0_23 = arith.constant 0 : index
    %c0_24 = arith.constant 0 : index
    %38 = vector.load %arg17[%c0_23, %c0_24] : memref<8x3xf32, #tpu.memory_space<vmem>>, vector<8x3xf32>
    tpu.vector_store %arg17[%c0_23, %c0_24], %37 {strides = array<i32>} : memref<8x3xf32, #tpu.memory_space<vmem>>, vector<8x3xf32>,
    %c0_25 = arith.constant 0 : index
    %c0_26 = arith.constant 0 : index
    %39 = vector.load %arg11[%c0_25, %c0_26] : memref<32x128xbf16, #tpu.memory_space<vmem>>, vector<32x128xbf16>
    %cst_27 = arith.constant dense<0.000000e+00> : vector<8x128xf32>
    %40 = tpu.matmul %1, %39, %cst_27 {dimension_numbers = #tpu.dot_dimension_numbers<[1], [0], [0], [1], [0, 0, 1, 1], [], []>} : vector<8x32xbf16>, vector<32x128xbf16>, vector<8x128xf32> -> vector<8x128xf32>
    %c0_28 = arith.constant 0 : index
    %c0_29 = arith.constant 0 : index
    %41 = vector.load %arg5[%c0_28, %c0_29] : memref<8x9xf32, #tpu.memory_space<vmem>>, vector<8x9xf32>
    %42 = arith.truncf %41 : vector<8x9xf32> to vector<8x9xbf16>
    %c0_30 = arith.constant 0 : index
    %c0_31 = arith.constant 0 : index
    %43 = vector.load %arg12[%c0_30, %c0_31] : memref<9x128xbf16, #tpu.memory_space<vmem>>, vector<9x128xbf16>
    %cst_32 = arith.constant dense<0.000000e+00> : vector<8x128xf32>
    %44 = tpu.matmul %42, %43, %cst_32 {dimension_numbers = #tpu.dot_dimension_numbers<[1], [0], [0], [1], [0, 0, 1, 1], [], []>} : vector<8x9xbf16>, vector<9x128xbf16>, vector<8x128xf32> -> vector<8x128xf32>
    %45 = arith.addf %40, %44 : vector<8x128xf32>
    %c0_33 = arith.constant 0 : index
    %c0_34 = arith.constant 0 : index
    %46 = vector.load %arg13[%c0_33, %c0_34] : memref<1x128xf32, #tpu.memory_space<vmem>>, vector<1x128xf32>
    %47 = vector.broadcast %46 : vector<1x128xf32> to vector<8x128xf32>
    %48 = arith.addf %45, %47 : vector<8x128xf32>
    %cst_35 = arith.constant 0.000000e+00 : f32
    %49 = vector.broadcast %cst_35 : f32 to vector<8x128xf32>
    %50 = arith.maximumf %48, %49 : vector<8x128xf32>
    %51 = arith.truncf %50 : vector<8x128xf32> to vector<8x128xbf16>
    %c0_36 = arith.constant 0 : index
    %c0_37 = arith.constant 0 : index
    %52 = vector.load %arg14[%c0_36, %c0_37] : memref<128x32xbf16, #tpu.memory_space<vmem>>, vector<128x32xbf16>
    %cst_38 = arith.constant dense<0.000000e+00> : vector<8x32xf32>
    %53 = tpu.matmul %51, %52, %cst_38 {dimension_numbers = #tpu.dot_dimension_numbers<[1], [0], [0], [1], [0, 0, 1, 1], [], []>} : vector<8x128xbf16>, vector<128x32xbf16>, vector<8x32xf32> -> vector<8x32xf32>
    %c0_39 = arith.constant 0 : index
    %c0_40 = arith.constant 0 : index
    %54 = vector.load %arg15[%c0_39, %c0_40] : memref<1x32xf32, #tpu.memory_space<vmem>>, vector<1x32xf32>
    %55 = vector.broadcast %54 : vector<1x32xf32> to vector<8x32xf32>
    %56 = arith.addf %53, %55 : vector<8x32xf32>
    %c0_41 = arith.constant 0 : index
    %c0_42 = arith.constant 0 : index
    %57 = vector.load %arg16[%c0_41, %c0_42] : memref<8x32xf32, #tpu.memory_space<vmem>>, vector<8x32xf32>
    tpu.vector_store %arg16[%c0_41, %c0_42], %56 {strides = array<i32>} : memref<8x32xf32, #tpu.memory_space<vmem>>, vector<8x32xf32>,
    return
  }
  func.func @transform_0(%arg0: i32) -> (i32, i32) {
    %c0_i32 = arith.constant 0 : i32
    %c0_i32_0 = arith.constant 0 : i32
    return %arg0, %c0_i32 : i32, i32
  }
  func.func @transform_1(%arg0: i32) -> (i32, i32) {
    %c0_i32 = arith.constant 0 : i32
    %c0_i32_0 = arith.constant 0 : i32
    return %arg0, %c0_i32 : i32, i32
  }
  func.func @transform_2(%arg0: i32) -> (i32, i32) {
    %c0_i32 = arith.constant 0 : i32
    %c0_i32_0 = arith.constant 0 : i32
    return %arg0, %c0_i32 : i32, i32
  }
  func.func @transform_3(%arg0: i32) -> (i32, i32, i32) {
    %c0_i32 = arith.constant 0 : i32
    %c0_i32_0 = arith.constant 0 : i32
    %c0_i32_1 = arith.constant 0 : i32
    return %arg0, %c0_i32, %c0_i32_0 : i32, i32, i32
  }
  func.func @transform_4(%arg0: i32) -> (i32, i32) {
    %c0_i32 = arith.constant 0 : i32
    %c0_i32_0 = arith.constant 0 : i32
    return %arg0, %c0_i32 : i32, i32
  }
  func.func @transform_5(%arg0: i32) -> (i32, i32) {
    %c0_i32 = arith.constant 0 : i32
    %c0_i32_0 = arith.constant 0 : i32
    %c0_i32_1 = arith.constant 0 : i32
    return %c0_i32, %c0_i32_0 : i32, i32
  }
  func.func @transform_6(%arg0: i32) -> (i32, i32) {
    %c0_i32 = arith.constant 0 : i32
    %c0_i32_0 = arith.constant 0 : i32
    %c0_i32_1 = arith.constant 0 : i32
    return %c0_i32, %c0_i32_0 : i32, i32
  }
  func.func @transform_7(%arg0: i32) -> (i32, i32) {
    %c0_i32 = arith.constant 0 : i32
    %c0_i32_0 = arith.constant 0 : i32
    %c0_i32_1 = arith.constant 0 : i32
    return %c0_i32, %c0_i32_0 : i32, i32
  }
  func.func @transform_8(%arg0: i32) -> (i32, i32) {
    %c0_i32 = arith.constant 0 : i32
    %c0_i32_0 = arith.constant 0 : i32
    %c0_i32_1 = arith.constant 0 : i32
    return %c0_i32, %c0_i32_0 : i32, i32
  }
  func.func @transform_9(%arg0: i32) -> (i32, i32) {
    %c0_i32 = arith.constant 0 : i32
    %c0_i32_0 = arith.constant 0 : i32
    %c0_i32_1 = arith.constant 0 : i32
    return %c0_i32, %c0_i32_0 : i32, i32
  }
  func.func @transform_10(%arg0: i32) -> (i32, i32) {
    %c0_i32 = arith.constant 0 : i32
    %c0_i32_0 = arith.constant 0 : i32
    %c0_i32_1 = arith.constant 0 : i32
    return %c0_i32, %c0_i32_0 : i32, i32
  }
  func.func @transform_11(%arg0: i32) -> (i32, i32) {
    %c0_i32 = arith.constant 0 : i32
    %c0_i32_0 = arith.constant 0 : i32
    %c0_i32_1 = arith.constant 0 : i32
    return %c0_i32, %c0_i32_0 : i32, i32
  }
  func.func @transform_12(%arg0: i32) -> (i32, i32) {
    %c0_i32 = arith.constant 0 : i32
    %c0_i32_0 = arith.constant 0 : i32
    %c0_i32_1 = arith.constant 0 : i32
    return %c0_i32, %c0_i32_0 : i32, i32
  }
  func.func @transform_13(%arg0: i32) -> (i32, i32) {
    %c0_i32 = arith.constant 0 : i32
    %c0_i32_0 = arith.constant 0 : i32
    %c0_i32_1 = arith.constant 0 : i32
    return %c0_i32, %c0_i32_0 : i32, i32
  }
  func.func @transform_14(%arg0: i32) -> (i32, i32) {
    %c0_i32 = arith.constant 0 : i32
    %c0_i32_0 = arith.constant 0 : i32
    %c0_i32_1 = arith.constant 0 : i32
    return %c0_i32, %c0_i32_0 : i32, i32
  }
  func.func @transform_15(%arg0: i32) -> (i32, i32) {
    %c0_i32 = arith.constant 0 : i32
    %c0_i32_0 = arith.constant 0 : i32
    return %arg0, %c0_i32 : i32, i32
  }
  func.func @transform_16(%arg0: i32) -> (i32, i32) {
    %c0_i32 = arith.constant 0 : i32
    %c0_i32_0 = arith.constant 0 : i32
    return %arg0, %c0_i32 : i32, i32
  }
}

</mosaic_0001>

<bundles_post_ra>
// kernel: tpu_custom_call.1
= control target key start
LH: loop header
LB: loop body
LE: loop exit
PB: predicated region body
PF: predicated region fallthrough
CT: control target
= control target key end

     0   :  { %s2595_s0 = inlined_call_operand.vmem [shape: f32[32,32], index: 0, kind: input, shape index: {}]   ;;  %s2596_s1 = inlined_call_operand.vmem [shape: f32[32,3], index: 1, kind: input, shape index: {}]   ;;  %s2597_s2 = inlined_call_operand.vmem [shape: bf16[512,42], index: 2, kind: input, shape index: {}]   ;;  %s2598_s3 = inlined_call_operand.vmem [shape: f32[32,16,4], index: 3, kind: input, shape index: {}]   ;;  %s2599_s4 = inlined_call_operand.vmem [shape: f32[32,9], index: 4, kind: input, shape index: {}]   ;;  %s2600_s5 = inlined_call_operand.vmem [shape: bf16[42,128], index: 5, kind: input, shape index: {}]   ;;  %s2601_s6 = inlined_call_operand.vmem [shape: bf16[32,128], index: 6, kind: input, shape index: {}]   ;;  %s2602_s7 = inlined_call_operand.vmem [shape: f32[1,128], index: 7, kind: input, shape index: {}]   ;;  %s2603_s8 = inlined_call_operand.vmem [shape: bf16[128,1], index: 8, kind: input, shape index: {}]   ;;  %s2604_s9 = inlined_call_operand.<no memory space> [shape: f32[1,1], index: 9, kind: input, shape index: {}]   ;;  %s2605_s10 = inlined_call_operand.vmem [shape: bf16[32,128], index: 10, kind: input, shape index: {}]   ;;  %s2606_s11 = inlined_call_operand.vmem [shape: bf16[9,128], index: 11, kind: input, shape index: {}]   ;;  %s2607_s12 = inlined_call_operand.vmem [shape: f32[1,128], index: 12, kind: input, shape index: {}]   ;;  %s2608_s13 = inlined_call_operand.vmem [shape: bf16[128,32], index: 13, kind: input, shape index: {}]   ;;  %s2609_s14 = inlined_call_operand.vmem [shape: f32[1,32], index: 14, kind: input, shape index: {}]   ;;  %s2610_s15 = inlined_call_operand.hbm [shape: f32[32,32], index: 15, kind: output, shape index: {0}]   ;;  %s2611_s16 = inlined_call_operand.vmem [shape: f32[32,3], index: 16, kind: output, shape index: {1}]  }
   0x1   :  { %2615 = sst [smem:[#allocation9_spill]] %s2595_s0  ;;  %v22_v0 = vstv %s2604_s9 }
   0x2   :  { %2616 = sst [smem:[#allocation10_spill]] %s2597_s2  ;;  %23 = vst [vmem:[#allocation2] sm:$0x1] %v22_v0 }
   0x3   :  { %2617 = sst [smem:[#allocation11_spill]] %s2598_s3 }
   0x4   :  { %2618 = sst [smem:[#allocation12_spill]] %s2599_s4 }
   0x5   :  { %24 = vsyncpa [#allocation4], 0 }
   0x6   :  { %26 = vsyncpa [#allocation4 + $0x1], 0  ;;  %s2281_s23 = smov 0   ;;  %s2283_s24 = smov 0  }
   0x7   :  { %s2285_s25 = smov 0   ;;  %s2287_s26 = smov 0  }
   0x8 LB: > { %2619 = sst [smem:[#allocation6_spill]] %s2180_s25  ;;  %s2302_s9 = sadd.s32 4294967295, %s2184_s26   ;;  %s2184_s26 = sphi %s2287_s26, %s2628_s26   ;;  %s2180_s25 = sphi %s2285_s25, %s2630_s25   ;;  %s2176_s24 = sphi %s2283_s24, %s2632_s24   ;;  %s2172_s23 = sphi %s2281_s23, %s2631_s23  }
   0x9   : > { %s1836_s27 = sadd.s32 4294967294, %s2184_s26   ;;  %s2306_s28 = sadd.s32 1, %s2184_s26  }
   0xa   : > { %2620 = sst [smem:[#allocation7_spill]] %s2306_s28  ;;  %s379_s29 = sadd.s32 1, %s2180_s25 }
   0xb   : > { %s376_s30 = ssub.s32 %s2184_s26, %s2306_s28  ;;  %p389_p0 = scmp.ne.s32.totalorder %s2180_s25, %s2176_s24 }
   0xc   : > { %p377_p1 = scmp.eq.s32.totalorder %s376_s30, 0  ;;  %p390_p2 = scmp.eq.s32.totalorder %s2302_s9, 3 }
   0xd   : > { %p395_p3 = scmp.ne.s32.totalorder %s2176_s24, %s2172_s23  ;;  %p396_p4 = scmp.eq.s32.totalorder %s1836_s27, 3 }
   0xe   : > { %s2317_s0 = scalar_select %p377_p1, %s2180_s25, %s379_s29  }
   0xf   : > { %p2319_p5 = por %p390_p2, %p389_p0  ;;  %p2323_p6 = por %p396_p4, %p395_p3 }
  0x10   : > { %2621 = sst [smem:[#allocation8_spill]] %s2317_s0  ;;  %p1839_p7 = scmp.ge.s32.totalorder %s2184_s26, 1 }
  0x11   : > { %p510_p8 = scmp.lt.s32.totalorder %s2184_s26, 5 }
  0x13   : > { %p511_p9 = pnand %p1839_p7, %p510_p8 }
  0x14   : > { %s1843_s30 = sshll.u32 (!%p511_p9), %s2302_s9, 4  ;;  %s2624_s2 = sld [smem:[#allocation10_spill]] (!%p511_p9) }
  0x15   : > { %514 = sbr.rel (%p511_p9) target bundleno = 786 (0x312), region = 80  ;;  %p591_p10 = scmp.lt.s32.totalorder (!%p511_p9), %s1843_s30, 63 }
  0x16   : > { %p582_p11 = scmp.lt.s32.totalorder (!%p511_p9), %s2302_s9, 3  ;;  %s2626_s4 = sld [smem:[#allocation12_spill]] (!%p511_p9) }
  0x17   : > { %s1845_s20 = sshll.u32 (!%p511_p9), %s2302_s9, 3  ;;  %s2627_s3 = sld [smem:[#allocation11_spill]] (!%p511_p9) }
  0x18   : > { %p597_p12 = scmp.lt.s32.totalorder (!%p511_p9), %s1845_s20, 31 }
  0x1a   : > { %v2092_v1 = vld [vmem:[%s2600_s5 + $0x10] sm:$0x1f]   ;;  %vm719_vm0 = vcmask 1044480   ;;  %v2094_v3 = vld [vmem:[%s2600_s5 + $0x8] sm:$0xff]   ;;  %v2095_v4 = vld [vmem:[%s2600_s5] sm:$0xff]   ;;  %s2634_s30 = smov (!%p591_p10, %s1843_s30), 63  ;;  %v900_v50 = vlaneseq }
  0x1b   : > { %2042 = vmatprep.subr.msk.bf16.mxu0 %vm719_vm0, %v2092_v1  ;;  %v721_v2 = vsel %vm719_vm0, %v2092_v1, 0  ;;  %vm694_vm1 = vcmask 343040   ;;  %s1844_s19 = sshll.u32 %s2634_s30, 2  ;;  %v2098_v5 = vld [vmem:[%s2601_s6 + $0x8] sm:$0xff]   ;;  %v2186_v8 = vmov 0.0   ;;  %v2103_v10 = vld [vmem:[%s2601_s6] sm:$0xff]  }
  0x1c   : > { %1947 = vmatpush3.bf16.msra.mxu0 %v721_v2  ;;  %s594_s21 = scalar_lea.vmem %s2624_s2, %s1844_s19  ;;  %vm1464_vm2 = vcmask 1043456   ;;  %s2625_s30 = sld [smem:[#allocation9_spill]]  ;;  %v2187_v16 = vmov 65535   ;;  %v2093_v18 = vld [vmem:[%s2606_s11] sm:$0x1f]   ;;  %vm2188_vm3 = vmmov 0  }
  0x1d   : > { %1948 = vmatprep.subr.bf16.mxu0 %v2094_v3  ;;  %v2096_v6 = vld [vmem:[%s594_s21] sm:$0xff]   ;;  %v2097_v7 = vld [vmem:[%s594_s21 + $0x8] sm:$0xff]   ;;  %v2099_v9 = vld [vmem:[%s594_s21 + $0x10] sm:$0xff]   ;;  %s583_s25 = scalar_select %p582_p11, %s2302_s9, 3  ;;  %v1465_v17 = vsel %vm1464_vm2, 4294967295, %v2187_v16  ;;  %vm843_vm4 = vcmask 261120  }
  0x1e   : > { %1952 = vmatprep.mubr.msk.bf16.mxu0 %vm694_vm1, %v2096_v6  ;;  %v2100_v11 = vld [vmem:[%s594_s21 + $0x18] sm:$0xff]   ;;  %v2101_v12 = vld [vmem:[%s594_s21 + $0x20] sm:$0xff]   ;;  %v2102_v13 = vld [vmem:[%s594_s21 + $0x28] sm:$0xff]   ;;  %v1466_v20 = vsel %vm719_vm0, %v1465_v17, 0  ;;  %v2189_v31 = vmov 0   ;;  %vm1460_vm5 = vcmask 72704  }
  0x1f   : > { %v2104_v14 = vld [vmem:[%s594_s21 + $0x30] sm:$0xff]   ;;  %s2362_s28 = sshll.u32 %s583_s25, 3  ;;  %v2105_v15 = vld [vmem:[%s594_s21 + $0x38] sm:$0xff]   ;;  %v1468_v22 = vand.u32 %v2093_v18, %v1466_v20  ;;  %v2108_v25 = vld [vmem:[%s2603_s8 + $0x28] sm:$0xff]   ;;  %2088 = vset.pattern.permute.xlu1 %v2189_v31  ;;  %2089 = vset.pattern.permute.xlu0 %v2189_v31  ;;  %v2190_v48 = vmov 1966171168  }
  0x20   : > { %1949 = vmatpush3.bf16.msra.mxu0 %v2094_v3  ;;  %v2106_v23 = vld [vmem:[%s2603_s8 + $0x38] sm:$0xff]   ;;  %v2107_v24 = vld [vmem:[%s2603_s8 + $0x30] sm:$0xff]   ;;  %v2109_v26 = vld [vmem:[%s2603_s8 + $0x20] sm:$0xff]   ;;  %s606_s21 = scalar_lea.vmem %s2626_s4, %s2362_s28  ;;  %v898_v49 = vunpack.c.l.s4 %v2190_v48  ;;  %v901_v54 = vshrl.u32 %v900_v50, 7  ;;  %s2636_s20 = smov (!%p597_p12, %s1845_s20), 31  ;;  %vm1313_vm6 = vcmask 31744  }
  0x21   : > { %1950 = vmatprep.subr.bf16.mxu0 %v2095_v4  ;;  %1976 = vmatprep.subr.bf16.mxu1 %v2106_v23  ;;  %v2110_v27 = vld [vmem:[%s2603_s8 + $0x18] sm:$0xff]   ;;  %v2111_v28 = vld [vmem:[%s2603_s8 + $0x10] sm:$0xff]   ;;  %v2112_v29 = vld [vmem:[%s2603_s8 + $0x8] sm:$0xff]   ;;  %s1901_s0 = sshll.u32 %s2636_s20, 4  ;;  %vm1418_vm7 = vcmask 1041409   ;;  %vm1420_vm8 = vcmask 1042434  }
  0x22   : > { %s585_s19 = scalar_lea.vmem %s2625_s30, %s2362_s28  ;;  %1977 = vmatpush3.bf16.msra.mxu1 %v2106_v23  ;;  %v2113_v30 = vld [vmem:[%s2603_s8] sm:$0xff]   ;;  %v2114_v33 = vld [vmem:[%s2605_s10 + $0x8] sm:$0xff]   ;;  %v899_v53 = vunpack.c.0.s8 %v898_v49  ;;  %s2501_s25 = scalar_lea.vmem %s2627_s3, %s1901_s0  ;;  %vm1422_vm9 = vcmask 1043459   ;;  %vm1424_vm10 = vcmask 1044484   ;;  %vm1426_vm11 = vcmask 1045509  }
  0x23   : > { %v612_v19 = vld [vmem:[%s585_s19] sm:$0xff]  ;;  %1978 = vmatprep.subr.bf16.mxu1 %v2107_v24  ;;  %vm1428_vm12 = vcmask 1046534   ;;  %s573_s30 = sand.u32 1, %s2176_s24   ;;  %vm1430_vm13 = vcmask 1047559   ;;  %s1898_s0 = sshll.u32 %s2302_s9, 7 }
  0x24   : > { %1951 = vmatpush3.bf16.msra.mxu0 %v2095_v4  ;;  %v613_v21 = vpack.c.bf16 %v612_v19, %v612_v19  ;;  %v1451_v32 = vld [vmem:[%s606_s21] sm:$0xff]  ;;  %v902_v58 = vsub.s32 %v899_v53, %v901_v54  ;;  %s1840_s19 = sshll.u32 %s573_s30, 3  ;;  %s1700_s27 = scalar_lea.hbm %s2610_s15, %s1898_s0 }
  0x25   : > { %1968 = vmatprep.subr.bf16.mxu0 %v2186_v8  ;;  %v1452_v34 = vpack.c.bf16 %v1451_v32, %v1451_v32  ;;  %v2115_v35 = vld [vmem:[%s2605_s10] sm:$0xff]   ;;  %s575_s20 = scalar_lea.vmem [#allocation3], %s1840_s19  ;;  %s1685_s29 = scalar_lea.sflag [#allocation4], %s573_s30 }
  0x26   : > { %1979 = vmatpush3.bf16.msra.mxu1 %v2107_v24  ;;  %v1869_v57 = vld [vmem:[%s2602_s7] ss:$0 sm:$0xff]  ;;  %s1702_s21 = sshll.u32 %s575_s20, 4  ;;  %s2192_s19 = smov [#allocation3]   ;;  %s1703_s21 = int_to_ptr.vmem [resolvable:$true] %s1702_s21 }
  0x27   : > { %1953 = vmatmul.mubr.msk.bf16.vlgmr.msra.gmra.mxu0 %vm694_vm1, %v2097_v7  ;;  %1980 = vmatprep.subr.bf16.mxu1 %v2108_v25  ;;  %s2124_s2 = scalar_lea.vmem %s1703_s21, 128  ;;  %s2128_s3 = sshll.u32 %s2192_s19, 4  ;;  %s2129_s3 = int_to_ptr.vmem [resolvable:$false] %s2128_s3 }
  0x28   : > { %1969 = vmatpush3.bf16.msra.mxu0 %v2098_v5  ;;  %1956 = vmatprep.mubr.msk.bf16.mxu0 %vm694_vm1, %v2099_v9  ;;  %v966_v9 = vsub.s32 0, %v901_v54  ;;  %p2125_p13 = scmp.ne.s32.totalorder %s1703_s21, %s2124_s2  ;;  %s2130_s4 = scalar_lea.vmem %s2129_s3, 256 }
  0x29   : > { %1970 = vmatprep.subr.bf16.mxu0 %v2186_v8  ;;  %p2131_p2 = scmp.lt.s32.totalorder %s1703_s21, %s2129_s3  ;;  %p2132_p3 = scmp.lt.s32.totalorder %s2130_s4, %s2124_s2 }
  0x2a   : > { %1981 = vmatpush3.bf16.msra.mxu1 %v2108_v25  ;;  %p2126_p0 = pnand %p2125_p13, %p2319_p5 }
  0x2b   : > { %1982 = vmatprep.subr.bf16.mxu1 %v2109_v26  ;;  %p2133_p4 = por %p2132_p3, %p2131_p2 }
  0x2c   : > { %1971 = vmatpush3.bf16.msra.mxu0 %v2103_v10  ;;  %p2127_p1 = pneg %p2126_p0 }
  0x2d   : > { %2008 = vmatprep.subr.bf16.mxu0 %v2186_v8 }
  0x2e   : > { %1983 = vmatpush3.bf16.msra.mxu1 %v2109_v26  ;;  %p2134_p7 = pnand %p2133_p4, %p2127_p1 }
  0x2f   : > { %1957 = vmatmul.mubr.msk.bf16.gmra.mxu0 %vm694_vm1, %v2100_v11  ;;  %1984 = vmatprep.subr.bf16.mxu1 %v2110_v27 }
  0x30   : > { %1960 = vmatprep.mubr.msk.bf16.mxu0 %vm694_vm1, %v2101_v12 }
  0x32   : > { %1985 = vmatpush3.bf16.msra.mxu1 %v2110_v27 }
  0x33   : > { %1986 = vmatprep.subr.bf16.mxu1 %v2111_v28 }
  0x36   : > { %1987 = vmatpush3.bf16.msra.mxu1 %v2111_v28 }
  0x37   : > { %1961 = vmatmul.mubr.msk.bf16.gmra.mxu0 %vm694_vm1, %v2102_v13  ;;  %1988 = vmatprep.subr.bf16.mxu1 %v2112_v29 }
  0x38   : > { %1964 = vmatprep.mubr.msk.bf16.mxu0 %vm694_vm1, %v2104_v14 }
  0x3a   : > { %1989 = vmatpush3.bf16.msra.mxu1 %v2112_v29 }
  0x3b   : > { %1990 = vmatprep.subr.bf16.mxu1 %v2113_v30 }
  0x3e   : > { %1991 = vmatpush3.bf16.msra.mxu1 %v2113_v30 }
  0x3f   : > { %1965 = vmatmul.mubr.msk.bf16.gmra.mxu0 %vm694_vm1, %v2105_v15  ;;  %2022 = vmatprep.subr.bf16.mxu1 %v2186_v8 }
  0x40   : > { %1972 = vmatprep.mubr.msk.bf16.mxu0 %vm2188_vm3, %v2186_v8 }
  0x47   : > { %1973 = vmatmul.mubr.msk.bf16.vlgmr.msra.gmra.mxu0 %vm843_vm4, %v613_v21 }
  0x48   : > { %2009 = vmatpush3.bf16.msra.mxu0 %v1468_v22  ;;  %2010 = vmatprep.mubr.msk.bf16.mxu0 %vm2188_vm3, %v2186_v8 }
  0x49   : > { %2014 = vmatprep.subr.bf16.mxu0 %v2186_v8 }
  0x4f   : > { %2011 = vmatmul.mubr.msk.bf16.vlgmr.msra.gmra.mxu0 %vm1460_vm5, %v1452_v34 }
  0x50   : > { %2015 = vmatpush3.bf16.msra.mxu0 %v2114_v33  ;;  %2018 = vmatprep.mubr.msk.bf16.mxu0 %vm2188_vm3, %v2186_v8 }
  0x51   : > { %2016 = vmatprep.subr.bf16.mxu0 %v2186_v8 }
  0x54   : > { %2017 = vmatpush3.bf16.msra.mxu0 %v2115_v35 }
  0x57   : > { %2019 = vmatmul.mubr.msk.bf16.vlgmr.msra.gmra.mxu0 %vm843_vm4, %v613_v21 }
  0xe7   : > { %v1954_v36 = vpop.f32.mrf.mxu0 }
  0xe9   : > { %v757_v37 = vpop.f32.mrf.mxu0 }
  0xeb   : > { %v1955_v38 = vpop.f32.mrf.mxu0 }
  0xec   : > { %v888_v19 = vpack.c.bf16 %v1955_v38, %v1954_v36 }
  0xed   : > { %v760_v39 = vpop.f32.mrf.mxu0 }
  0xee   : > { %v887_v20 = vpack.c.bf16 %v760_v39, %v757_v37 }
  0xef   : > { %v2420_v40 = vpop.f32.mrf.mxu0 }
  0xf1   : > { %v773_v41 = vpop.f32.mrf.mxu0 }
  0xf3   : > { %v2422_v42 = vpop.f32.mrf.mxu0 }
  0xf4   : > { %v890_v39 = vpack.c.bf16 %v2422_v42, %v2420_v40 }
  0xf5   : > { %v776_v43 = vpop.f32.mrf.mxu0 }
  0xf6   : > { %v889_v23 = vpack.c.bf16 %v776_v43, %v773_v41 }
  0xf7   : > { %v2424_v44 = vpop.f32.mrf.mxu0 }
  0xf9   : > { %v2426_v45 = vpop.f32.mrf.mxu0 }
  0xfb   : > { %v2428_v46 = vpop.f32.mrf.mxu0 }
  0xfc   : > { %v892_v40 = vpack.c.bf16 %v2428_v46, %v2424_v44  ;;  %v2116_v46 = vld [vmem:[%s2608_s13 + $0x38] sm:$0xff]  }
  0xfd   : > { %v2430_v47 = vpop.f32.mrf.mxu0 }
  0xfe   : > { %v891_v41 = vpack.c.bf16 %v2430_v47, %v2426_v45 }
  0xff   : > { %v2432_v51 = vpop.f32.mrf.mxu0 }
 0x101   : > { %v2434_v52 = vpop.f32.mrf.mxu0 }
 0x103   : > { %v2436_v55 = vpop.f32.mrf.mxu0 }
 0x105   : > { %v2438_v56 = vpop.f32.mrf.mxu0 }
 0x106   : > { %v893_v42 = vpack.c.bf16 %v2438_v56, %v2434_v52  ;;  %v2117_v56 = vld [vmem:[%s2608_s13 + $0x30] sm:$0xff]  }
 0x107   : > { %v881_v59 = vpop.f32.mrf.mxu0 }
 0x108   : > { %v882_v60 = vadd.f32 %v1869_v57, %v881_v59 }
 0x109   : > { %v1974_v61 = vpop.f32.mrf.mxu0 }
 0x10a   : > { %v896_v62 = vcombine.high %v882_v60, %v882_v60  ;;  %v903_v63 = vrot.slane %v882_v60, %v902_v58 }
 0x10b   : > { %v884_v0 = vpop.f32.mrf.mxu0 }
 0x10c   : > { %v910_v1 = vrot.slane %v896_v62, %v902_v58  ;;  %v911_v2 = vcombine.high %v903_v63, %v903_v63  ;;  %v919_v3 = vrot.slane %v903_v63, %v902_v58 }
 0x10d   : > { %v1975_v4 = vpop.f32.mrf.mxu0 }
 0x10e   : > { %v926_v5 = vrot.slane %v910_v1, %v902_v58  ;;  %v933_v6 = vrot.slane %v911_v2, %v902_v58  ;;  %v941_v7 = vcombine.high %v919_v3, %v919_v3  ;;  %v953_v10 = vpack.c.bf16 %v919_v3, %v919_v3 }
 0x10f   : > { %v912_v11 = vcombine.high %v910_v1, %v910_v1  ;;  %v894_v3 = vpack.c.bf16 %v2436_v55, %v2432_v51  ;;  %v1504_v52 = vpop.f32.mrf.mxu0 }
 0x110   : > { %v943_v12 = vcombine.high %v933_v6, %v933_v6  ;;  %v954_v13 = vpack.c.bf16 %v933_v6, %v933_v6  ;;  %v955_v14 = vpack.c.bf16 %v941_v7, %v941_v7  ;;  %v957_v15 = vpack.c.bf16 %v926_v5, %v926_v5  ;;  %v2119_v7 = vld [vmem:[%s2608_s13 + $0x20] sm:$0xff]  }
 0x111   : > { %v962_v16 = vpack.i.b16 %v953_v10, %v953_v10  ;;  %v940_v24 = vrot.slane %v912_v11, %v902_v58  ;;  %v942_v27 = vcombine.high %v926_v5, %v926_v5  ;;  %v2012_v51 = vpop.f32.mrf.mxu0  ;;  %v2120_v11 = vld [vmem:[%s2608_s13 + $0x18] sm:$0xff]  }
 0x112   : > { %v956_v17 = vpack.c.bf16 %v943_v12, %v943_v12  ;;  %v969_v18 = vpack.i.b16 %v954_v13, %v954_v13  ;;  %v976_v21 = vpack.i.b16 %v955_v14, %v955_v14  ;;  %v990_v28 = vpack.i.b16 %v957_v15, %v957_v15  ;;  %v2121_v14 = vld [vmem:[%s2608_s13 + $0x10] sm:$0xff]   ;;  %v1887_v15 = vld [vmem:[%s2607_s12] ss:$0 sm:$0xff] }
 0x113   : > { %v967_v22 = vrot.slane %v962_v16, %v966_v9  ;;  %v958_v49 = vpack.c.bf16 %v940_v24, %v940_v24  ;;  %v959_v36 = vpack.c.bf16 %v942_v27, %v942_v27  ;;  %v944_v43 = vcombine.high %v940_v24, %v940_v24  ;;  %v1507_v55 = vpop.f32.mrf.mxu0 }
 0x114   : > { %v983_v25 = vpack.i.b16 %v956_v17, %v956_v17  ;;  %v974_v26 = vrot.slane %v969_v18, %v966_v9  ;;  %v981_v30 = vrot.slane %v976_v21, %v966_v9  ;;  %v995_v38 = vrot.slane %v990_v28, %v966_v9  ;;  %v2122_v17 = vld [vmem:[%s2608_s13 + $0x8] sm:$0xff]   ;;  %v1873_v21 = vld [vmem:[#allocation2] ss:$0 sm:$0xff] }
 0x115   : > { %v1017_v29 = vadd.bf16 %v967_v22, %v887_v20  ;;  %v997_v53 = vpack.i.b16 %v958_v49, %v958_v49  ;;  %v1004_v54 = vpack.i.b16 %v959_v36, %v959_v36  ;;  %v960_v60 = vpack.c.bf16 %v944_v43, %v944_v43  ;;  %v2013_v5 = vpop.f32.mrf.mxu0 }
 0x116   : > { %v1018_v32 = vadd.bf16 %v974_v26, %v888_v19  ;;  %v1019_v34 = vadd.bf16 %v981_v30, %v889_v23  ;;  %v988_v48 = vrot.slane %v983_v25, %v966_v9  ;;  %v1021_v57 = vadd.bf16 %v995_v38, %v891_v41  ;;  %v2123_v19 = vld [vmem:[%s2608_s13] sm:$0xff]   ;;  %v1207_v5 = vld [vmem:[%s2501_s25 + $0x30] sm:$0xff] }
 0x117   : > { %v1025_v33 = vmax.bf16 %v2189_v31, %v1017_v29  ;;  %v1002_v59 = vrot.slane %v997_v53, %v966_v9  ;;  %v1009_v62 = vrot.slane %v1004_v54, %v966_v9  ;;  %v1011_v47 = vpack.i.b16 %v960_v60, %v960_v60  ;;  %v1556_v6 = vpop.f32.mrf.mxu0 }
 0x118   : > { %v1026_v35 = vmax.bf16 %v2189_v31, %v1018_v32  ;;  %v1027_v37 = vmax.bf16 %v2189_v31, %v1019_v34  ;;  %v1020_v50 = vadd.bf16 %v988_v48, %v890_v39  ;;  %v1029_v61 = vmax.bf16 %v2189_v31, %v1021_v57 }
 0x119   : > { %1992 = vmatprep.mubr.bf16.mxu1 %v1025_v33  ;;  %v1022_v45 = vadd.bf16 %v1002_v59, %v892_v40  ;;  %v1023_v63 = vadd.bf16 %v1009_v62, %v893_v42  ;;  %v1016_v1 = vrot.slane %v1011_v47, %v966_v9  ;;  %v2020_v9 = vpop.f32.mrf.mxu0  ;;  %v1557_v13 = vadd.f32 %v1556_v6, %v1504_v52 }
 0x11a   : > { %1993 = vmatmul.mubr.bf16.vlgmr.msra.gmra.mxu1 %v1026_v35  ;;  %v1028_v58 = vmax.bf16 %v2189_v31, %v1020_v50  ;;  %v2191_v42 = vmov 3  }
 0x11b   : > { %1996 = vmatprep.mubr.bf16.mxu1 %v1027_v37  ;;  %v1030_v0 = vmax.bf16 %v2189_v31, %v1022_v45  ;;  %v1031_v2 = vmax.bf16 %v2189_v31, %v1023_v63  ;;  %v1024_v4 = vadd.bf16 %v1016_v1, %v894_v3  ;;  %2023 = vmatpush3.bf16.msra.mxu1 %v2116_v46  ;;  %v1559_v10 = vpop.f32.mrf.mxu0  ;;  %v1203_v45 = vld [vmem:[%s2501_s25 + $0x10] sm:$0xff]  ;;  %v1201_v63 = vld [vmem:[%s2501_s25] sm:$0xff]  ;;  %v1204_v1 = vld [vmem:[%s2501_s25 + $0x18] sm:$0xff] }
 0x11c   : > { %2024 = vmatprep.subr.bf16.mxu1 %v2186_v8  ;;  %v1569_v16 = vadd.f32 %v1887_v15, %v1557_v13 }
 0x11d   : > { %v1032_v44 = vmax.bf16 %v2189_v31, %v1024_v4  ;;  %v2118_v31 = vld [vmem:[%s2608_s13 + $0x28] sm:$0xff]   ;;  %v2021_v12 = vpop.f32.mrf.mxu0 }
 0x11e   : > { %v1570_v18 = vmax.f32 %v1569_v16, 0.0  ;;  %v1202_v4 = vld [vmem:[%s2501_s25 + $0x8] sm:$0xff]  ;;  %v1208_v12 = vld [vmem:[%s2501_s25 + $0x38] sm:$0xff] }
 0x11f   : > { %2025 = vmatpush3.bf16.msra.mxu1 %v2117_v56 }
 0x120   : > { %2026 = vmatprep.subr.bf16.mxu1 %v2186_v8  ;;  %v1571_v20 = vpack.c.bf16 %v1570_v18, %v1570_v18 }
 0x122   : > { %1997 = vmatmul.mubr.bf16.gmra.mxu1 %v1028_v58 }
 0x123   : > { %2000 = vmatprep.mubr.bf16.mxu1 %v1029_v61  ;;  %2027 = vmatpush3.bf16.msra.mxu1 %v2118_v31 }
 0x124   : > { %2028 = vmatprep.subr.bf16.mxu1 %v2186_v8 }
 0x127   : > { %2029 = vmatpush3.bf16.msra.mxu1 %v2119_v7 }
 0x128   : > { %2030 = vmatprep.subr.bf16.mxu1 %v2186_v8 }
 0x12a   : > { %2001 = vmatmul.mubr.bf16.gmra.mxu1 %v1030_v0 }
 0x12b   : > { %2004 = vmatprep.mubr.bf16.mxu1 %v1031_v2  ;;  %2031 = vmatpush3.bf16.msra.mxu1 %v2120_v11 }
 0x12c   : > { %2032 = vmatprep.subr.bf16.mxu1 %v2186_v8 }
 0x12f   : > { %2033 = vmatpush3.bf16.msra.mxu1 %v2121_v14 }
 0x130   : > { %2034 = vmatprep.subr.bf16.mxu1 %v2186_v8 }
 0x132   : > { %2005 = vmatmul.mubr.bf16.gmra.mxu1 %v1032_v44 }
 0x133   : > { %2038 = vmatprep.mubr.msk.bf16.mxu1 %vm2188_vm3, %v2186_v8  ;;  %2035 = vmatpush3.bf16.msra.mxu1 %v2122_v17  ;;  %v1205_v17 = vld [vmem:[%s2501_s25 + $0x20] sm:$0xff] }
 0x134   : > { %2036 = vmatprep.subr.bf16.mxu1 %v2186_v8 }
 0x137   : > { %2037 = vmatpush3.bf16.msra.mxu1 %v2123_v19 }
 0x13a   : > { %2039 = vmatmul.mubr.bf16.vlgmr.msra.gmra.mxu1 %v1571_v20 }
 0x1da   : > { %v1994_v22 = vpop.f32.mrf.mxu1 }
 0x1db   : > { %v1147_v23 = vadd.f32 %v1994_v22, %v1873_v21  ;;  %v1206_v22 = vld [vmem:[%s2501_s25 + $0x28] sm:$0xff] }
 0x1dc   : > { %v1138_v24 = vpop.f32.mrf.mxu1 }
 0x1dd   : > { %v1139_v25 = vadd.f32 %v1873_v21, %v1138_v24  ;;  %1229 = vperm.xlu1 %2088, %v1147_v23  }
 0x1de   : > { %v1995_v26 = vpop.f32.mrf.mxu1 }
 0x1df   : > { %v1150_v27 = vadd.f32 %v1995_v26, %v1873_v21  ;;  %1219 = vperm.xlu0 %2089, %v1139_v25  }
 0x1e0   : > { %v1141_v28 = vpop.f32.mrf.mxu1 }
 0x1e1   : > { %v1142_v29 = vadd.f32 %v1873_v21, %v1141_v28  ;;  %1234 = vperm.xlu1 %2088, %v1150_v27  }
 0x1e2   : > { %v1998_v30 = vpop.f32.mrf.mxu1 }
 0x1e3   : > { %1224 = vperm.xlu0 %2089, %v1142_v29   ;;  %v1163_v33 = vadd.f32 %v1998_v30, %v1873_v21  ;;  %v1211_v29 = vld [vmem:[%s2501_s25 + $0x50] sm:$0xff] }
 0x1e4   : > { %v1154_v32 = vpop.f32.mrf.mxu1 }
 0x1e5   : > { %v1155_v48 = vadd.f32 %v1873_v21, %v1154_v32 }
 0x1e6   : > { %v1999_v8 = vpop.f32.mrf.mxu1 }
 0x1e7   : > { %v1166_v34 = vadd.f32 %v1999_v8, %v1873_v21  ;;  %1249 = vperm.xlu0 %2089, %v1163_v33  }
 0x1e8   : > { %v1157_v35 = vpop.f32.mrf.mxu1 }
 0x1e9   : > { %1254 = vperm.xlu1 %2088, %v1166_v34   ;;  %v1158_v36 = vadd.f32 %v1873_v21, %v1157_v35  ;;  %v1212_v34 = vld [vmem:[%s2501_s25 + $0x58] sm:$0xff] }
 0x1ea   : > { %v2002_v49 = vpop.f32.mrf.mxu1 }
 0x1eb   : > { %1239 = vperm.xlu0 %2089, %v1155_v48   ;;  %v1179_v38 = vadd.f32 %v2002_v49, %v1873_v21 }
 0x1ec   : > { %v1170_v37 = vpop.f32.mrf.mxu1 }
 0x1ed   : > { %1244 = vperm.xlu1 %2088, %v1158_v36   ;;  %v1171_v50 = vadd.f32 %v1873_v21, %v1170_v37 }
 0x1ee   : > { %v2003_v39 = vpop.f32.mrf.mxu1 }
 0x1ef   : > { %v1182_v41 = vadd.f32 %v2003_v39, %v1873_v21  ;;  %1269 = vperm.xlu0 %2089, %v1179_v38  }
 0x1f0   : > { %v1173_v43 = vpop.f32.mrf.mxu1 }
 0x1f1   : > { %1274 = vperm.xlu1 %2088, %v1182_v41   ;;  %v1174_v54 = vadd.f32 %v1873_v21, %v1173_v43  ;;  %v1209_v43 = vld [vmem:[%s2501_s25 + $0x40] sm:$0xff] }
 0x1f2   : > { %v2006_v53 = vpop.f32.mrf.mxu1 }
 0x1f3   : > { %1259 = vperm.xlu0 %2089, %v1171_v50   ;;  %v1195_v61 = vadd.f32 %v2006_v53, %v1873_v21 }
 0x1f4   : > { %v1186_v57 = vpop.f32.mrf.mxu1 }
 0x1f5   : > { %v1187_v58 = vadd.f32 %v1873_v21, %v1186_v57  ;;  %1264 = vperm.xlu1 %2088, %v1174_v54  }
 0x1f6   : > { %v2007_v59 = vpop.f32.mrf.mxu1 }
 0x1f7   : > { %1279 = vperm.xlu0 %2089, %v1187_v58   ;;  %v1198_v40 = vadd.f32 %v2007_v59, %v1873_v21 }
 0x1f8   : > { %v1189_v60 = vpop.f32.mrf.mxu1 }
 0x1f9   : > { %v1190_v62 = vadd.f32 %v1873_v21, %v1189_v60  ;;  %v1210_v60 = vld [vmem:[%s2501_s25 + $0x48] sm:$0xff] }
 0x1fb   : > { %1284 = vperm.xlu1 %2088, %v1190_v62   ;;  %1289 = vperm.xlu0 %2089, %v1195_v61  }
 0x1ff   : > { %1294 = vperm.xlu1 %2088, %v1198_v40   ;;  %2091 = vset.pattern.permute.xlu0 %v2191_v42 }
 0x203   : > { %2090 = vset.pattern.permute.xlu1 %v2191_v42 }
 0x258   : > { %v1230_v47 = vpop.permute.xlu1 %1229 }
 0x259   : > { %v1299_v2 = vmul.f32 %v1230_v47, %v1203_v45 }
 0x25a   : > { %v1220_v0 = vpop.permute.xlu0 %1219 }
 0x25b   : > { %v1297_v44 = vmul.f32 %v1220_v0, %v1201_v63  ;;  %v1323_v56 = vsel %vm1313_vm6, %v1299_v2, 0.0 }
 0x25c   : > { %v1235_v3 = vpop.permute.xlu1 %1234 }
 0x25d   : > { %v1300_v46 = vmul.f32 %v1235_v3, %v1204_v1  ;;  %v1314_v6 = vsel %vm1313_vm6, %v1297_v44, 0.0  ;;  %v1213_v44 = vld [vmem:[%s2501_s25 + $0x60] sm:$0xff] }
 0x25e   : > { %v1225_v52 = vpop.permute.xlu0 %1224 }
 0x25f   : > { %v1324_v51 = vsel %vm1313_vm6, %v1300_v46, 0.0  ;;  %v1298_v55 = vmul.f32 %v1225_v52, %v1202_v4 }
 0x260   : > { %v1325_v31 = vadd.f32 %v1324_v51, %v1323_v56 }
 0x261   : > { %v1315_v7 = vsel %vm1313_vm6, %v1298_v55, 0.0 }
 0x262   : > { %v1326_v9 = vrot.slane %v1325_v31, 4  ;;  %v1316_v10 = vadd.f32 %v1315_v7, %v1314_v6  ;;  %v1250_v11 = vpop.permute.xlu0 %1249 }
 0x263   : > { %v1303_v13 = vmul.f32 %v1250_v11, %v1207_v5  ;;  %v1214_v5 = vld [vmem:[%s2501_s25 + $0x68] sm:$0xff] }
 0x264   : > { %v1327_v14 = vadd.f32 %v1326_v9, %v1325_v31  ;;  %v1317_v15 = vrot.slane %v1316_v10, 4  ;;  %v1255_v16 = vpop.permute.xlu1 %1254 }
 0x265   : > { %v1304_v18 = vmul.f32 %v1255_v16, %v1208_v12  ;;  %v1341_v23 = vsel %vm1313_vm6, %v1303_v13, 0.0  ;;  %v1215_v13 = vld [vmem:[%s2501_s25 + $0x70] sm:$0xff] }
 0x266   : > { %v1328_v19 = vrot.slane %v1327_v14, 2  ;;  %v1318_v20 = vadd.f32 %v1317_v15, %v1316_v10  ;;  %v1240_v21 = vpop.permute.xlu0 %1239 }
 0x267   : > { %v1342_v24 = vsel %vm1313_vm6, %v1304_v18, 0.0  ;;  %v1301_v25 = vmul.f32 %v1240_v21, %v1205_v17 }
 0x268   : > { %v1319_v26 = vrot.slane %v1318_v20, 2  ;;  %v1343_v27 = vadd.f32 %v1342_v24, %v1341_v23  ;;  %v1245_v28 = vpop.permute.xlu1 %1244  ;;  %v1329_v30 = vadd.f32 %v1328_v19, %v1327_v14  ;;  %v1216_v19 = vld [vmem:[%s2501_s25 + $0x78] sm:$0xff] }
 0x269   : > { %v1302_v32 = vmul.f32 %v1245_v28, %v1206_v22  ;;  %v1332_v49 = vsel %vm1313_vm6, %v1301_v25, 0.0 }
 0x26a   : > { %v1344_v33 = vrot.slane %v1343_v27, 4  ;;  %v1270_v8 = vpop.permute.xlu0 %1269  ;;  %v1330_v35 = vrot.slane %v1329_v30, 1  ;;  %v1320_v48 = vadd.f32 %v1319_v26, %v1318_v20 }
 0x26b   : > { %v1333_v36 = vsel %vm1313_vm6, %v1302_v32, 0.0  ;;  %v1307_v37 = vmul.f32 %v1270_v8, %v1211_v29 }
 0x26c   : > { %v1345_v38 = vadd.f32 %v1344_v33, %v1343_v27  ;;  %v1334_v39 = vadd.f32 %v1333_v36, %v1332_v49  ;;  %v1275_v41 = vpop.permute.xlu1 %1274  ;;  %v1331_v50 = vadd.f32 %v1330_v35, %v1329_v30  ;;  %v1321_v53 = vrot.slane %v1320_v48, 1 }
 0x26d   : > { %v1308_v54 = vmul.f32 %v1275_v41, %v1212_v34  ;;  %v1359_v62 = vsel %vm1313_vm6, %v1307_v37, 0.0  ;;  %v1677_v37 = vpop.f32.mrf.mxu1 }
 0x26e   : > { %v1346_v57 = vrot.slane %v1345_v38, 2  ;;  %v1335_v58 = vrot.slane %v1334_v39, 4  ;;  %v1260_v59 = vpop.permute.xlu0 %1259  ;;  %1392 = vperm.xlu1 %2090, %v1331_v50   ;;  %v1322_v61 = vadd.f32 %v1321_v53, %v1320_v48 }
 0x26f   : > { %v1360_v40 = vsel %vm1313_vm6, %v1308_v54, 0.0  ;;  %v1305_v42 = vmul.f32 %v1260_v59, %v1209_v43  ;;  %v2040_v43 = vpop.f32.mrf.mxu1 }
 0x270   : > { %v1336_v45 = vadd.f32 %v1335_v58, %v1334_v39  ;;  %v1361_v47 = vadd.f32 %v1360_v40, %v1359_v62  ;;  %v1265_v63 = vpop.permute.xlu1 %1264  ;;  %1388 = vperm.xlu0 %2091, %v1322_v61   ;;  %v1347_v0 = vadd.f32 %v1346_v57, %v1345_v38  ;;  %v1434_v1 = vsel %vm1418_vm7, %v1331_v50, %v1322_v61  ;;  %v1888_v50 = vld [vmem:[%s2609_s14] ss:$0 sm:$0xff] }
 0x271   : > { %v1306_v2 = vmul.f32 %v1265_v63, %v1210_v60  ;;  %v1350_v56 = vsel %vm1313_vm6, %v1305_v42, 0.0  ;;  %v1680_v58 = vpop.f32.mrf.mxu1  ;;  %v1678_v62 = vadd.f32 %v1888_v50, %v1677_v37 }
 0x272   : > { %v1337_v3 = vrot.slane %v1336_v45, 2  ;;  %v1362_v4 = vrot.slane %v1361_v47, 4  ;;  %v1280_v46 = vpop.permute.xlu0 %1279  ;;  %v1348_v52 = vrot.slane %v1347_v0, 1 }
 0x273   : > { %v1351_v51 = vsel %vm1313_vm6, %v1306_v2, 0.0  ;;  %v1309_v9 = vmul.f32 %v1280_v46, %v1213_v44  ;;  %v2041_v40 = vpop.f32.mrf.mxu1  ;;  %1683 = vst.msk [vmem:[%s575_s20] sm:$0xff] %vm843_vm4, %v1678_v62 }
 0x274   : > { %v1363_v55 = vadd.f32 %v1362_v4, %v1361_v47  ;;  %v1352_v31 = vadd.f32 %v1351_v51, %v1350_v56  ;;  %v1349_v6 = vadd.f32 %v1348_v52, %v1347_v0  ;;  %v1338_v7 = vadd.f32 %v1337_v3, %v1336_v45 }
 0x275   : > { %v1368_v21 = vsel %vm1313_vm6, %v1309_v9, 0.0 }
 0x276   : > { %v1364_v10 = vrot.slane %v1363_v55, 2  ;;  %v1353_v11 = vrot.slane %v1352_v31, 4  ;;  %v1285_v12 = vpop.permute.xlu1 %1284  ;;  %1400 = vperm.xlu0 %2091, %v1349_v6   ;;  %v1290_v14 = vpop.permute.xlu0 %1289  ;;  %v1339_v15 = vrot.slane %v1338_v7, 1 }
 0x277   : > { %v1310_v16 = vmul.f32 %v1285_v12, %v1214_v5  ;;  %v1311_v23 = vmul.f32 %v1290_v14, %v1215_v13 }
 0x278   : > { %v1354_v17 = vadd.f32 %v1353_v11, %v1352_v31  ;;  %v1340_v18 = vadd.f32 %v1339_v15, %v1338_v7  ;;  %v1365_v20 = vadd.f32 %v1364_v10, %v1363_v55 }
 0x279   : > { %v1369_v22 = vsel %vm1313_vm6, %v1310_v16, 0.0  ;;  %v1377_v34 = vsel %vm1313_vm6, %v1311_v23, 0.0 }
 0x27a   : > { %v1355_v24 = vrot.slane %v1354_v17, 2  ;;  %v1370_v25 = vadd.f32 %v1369_v22, %v1368_v21  ;;  %1396 = vperm.xlu1 %2090, %v1340_v18   ;;  %v1295_v26 = vpop.permute.xlu1 %1294  ;;  %v1366_v27 = vrot.slane %v1365_v20, 1  ;;  %v1435_v28 = vsel %vm1420_vm8, %v1340_v18, %v1434_v1 }
 0x27b   : > { %v1312_v29 = vmul.f32 %v1295_v26, %v1216_v19  ;;  %v1436_v30 = vsel %vm1422_vm9, %v1349_v6, %v1435_v28 }
 0x27c   : > { %v1371_v32 = vrot.slane %v1370_v25, 4  ;;  %v1367_v33 = vadd.f32 %v1366_v27, %v1365_v20  ;;  %v1356_v8 = vadd.f32 %v1355_v24, %v1354_v17 }
 0x27d   : > { %v1378_v35 = vsel %vm1313_vm6, %v1312_v29, 0.0 }
 0x27e   : > { %v1372_v48 = vadd.f32 %v1371_v32, %v1370_v25  ;;  %v1379_v49 = vadd.f32 %v1378_v35, %v1377_v34  ;;  %1408 = vperm.xlu0 %2091, %v1367_v33   ;;  %v1357_v36 = vrot.slane %v1356_v8, 1 }
 0x280   : > { %v1373_v38 = vrot.slane %v1372_v48, 2  ;;  %v1380_v39 = vrot.slane %v1379_v49, 4  ;;  %v1358_v41 = vadd.f32 %v1357_v36, %v1356_v8 }
 0x282   : > { %v1381_v53 = vadd.f32 %v1380_v39, %v1379_v49  ;;  %1404 = vperm.xlu1 %2090, %v1358_v41   ;;  %v1374_v54 = vadd.f32 %v1373_v38, %v1372_v48  ;;  %v1437_v57 = vsel %vm1424_vm10, %v1358_v41, %v1436_v30 }
 0x283   : > { %v1438_v59 = vsel %vm1426_vm11, %v1367_v33, %v1437_v57 }
 0x284   : > { %v1382_v60 = vrot.slane %v1381_v53, 2  ;;  %v1375_v61 = vrot.slane %v1374_v54, 1 }
 0x286   : > { %v1376_v42 = vadd.f32 %v1375_v61, %v1374_v54  ;;  %v1383_v45 = vadd.f32 %v1382_v60, %v1381_v53 }
 0x288   : > { %1412 = vperm.xlu1 %2090, %v1376_v42   ;;  %v1384_v47 = vrot.slane %v1383_v45, 1  ;;  %v1439_v63 = vsel %vm1428_vm12, %v1376_v42, %v1438_v59 }
 0x28a   : > { %v1385_v0 = vadd.f32 %v1384_v47, %v1383_v45 }
 0x28c   : > { %1416 = vperm.xlu0 %2091, %v1385_v0   ;;  %v1440_v1 = vsel %vm1430_vm13, %v1385_v0, %v1439_v63 }
 0x28d   : > { %2137 = shalt.err (!%p2134_p7)
}
 0x28e   : > { %s2138_s9 = scalar_lea.hbm %s1700_s27, 128  ;;  %s2142_s0 = scalar_lea.hbm %s2610_s15, 512 }
 0x28f   : > { %p2139_p8 = scmp.ne.s32.totalorder %s1700_s27, %s2138_s9  ;;  %p2143_p11 = scmp.lt.s32.totalorder %s1700_s27, %s2610_s15 }
 0x290   : > { %p2144_p12 = scmp.lt.s32.totalorder %s2142_s0, %s2138_s9 }
 0x291   : > { %p2140_p9 = pnand %p2139_p8, %p2319_p5 }
 0x292   : > { %p2145_p13 = por %p2144_p12, %p2143_p11 }
 0x293   : > { %p2141_p10 = pneg %p2140_p9 }
 0x295   : > { %p2146_p0 = pnand %p2145_p13, %p2141_p10 }
 0x297   : > { %2149 = shalt.err (!%p2146_p0)
}
 0x298   : > { %2043 = dma.vmem_to_hbm [thread:$0]  (%p2319_p5), %s1703_s21, 128, %s1700_s27, %s1685_s29   ;;  %vm1445_vm14 = vcmask 23552  }
 0x299   : > { %s589_s4 = scalar_lea.vmem %s2596_s1, %s2362_s28  ;;  %s610_s27 = scalar_lea.vmem %s2611_s16, %s2362_s28 }
 0x29a   : > { %v614_v7 = vld [vmem:[%s589_s4] sm:$0xff] }
 0x2e9   : > { %v1393_v2 = vpop.permute.xlu1 %1392 }
 0x2eb   : > { %v1389_v3 = vpop.permute.xlu0 %1388 }
 0x2ec   : > { %v1419_v44 = vsel %vm1418_vm7, %v1393_v2, %v1389_v3 }
 0x2f1   : > { %v1401_v46 = vpop.permute.xlu0 %1400 }
 0x2f5   : > { %v1397_v4 = vpop.permute.xlu1 %1396 }
 0x2f6   : > { %v1421_v52 = vsel %vm1420_vm8, %v1397_v4, %v1419_v44 }
 0x2f7   : > { %v1423_v51 = vsel %vm1422_vm9, %v1401_v46, %v1421_v52 }
 0x2f9   : > { %v1409_v55 = vpop.permute.xlu0 %1408 }
 0x2fd   : > { %v1405_v56 = vpop.permute.xlu1 %1404 }
 0x2fe   : > { %v1425_v31 = vsel %vm1424_vm10, %v1405_v56, %v1423_v51 }
 0x2ff   : > { %v1427_v6 = vsel %vm1426_vm11, %v1409_v55, %v1425_v31 }
 0x303   : > { %v1413_v5 = vpop.permute.xlu1 %1412 }
 0x304   : > { %v1429_v9 = vsel %vm1428_vm12, %v1413_v5, %v1427_v6 }
 0x307   : > { %v1417_v10 = vpop.permute.xlu0 %1416 }
 0x308   : > { %v1431_v11 = vsel %vm1430_vm13, %v1417_v10, %v1429_v9 }
 0x309   : > { %v1433_v12 = vmul.f32 %v1431_v11, %v614_v7 }
 0x30b   : > { %v1442_v13 = vsub.f32 %v1433_v12, %v1440_v1 }
 0x30d   : > { %v1443_v14 = vmul.f32 0.06666667, %v1442_v13 }
 0x30f   : > { %v1444_v15 = vadd.f32 %v1443_v14, %v614_v7 }
 0x311   : > { %1446 = vst.msk [vmem:[%s610_s27] sm:$0xff] %vm1445_vm14, %v1444_v15 }
 0x312 PF: > { %p2049_p5 = scmp.ge.s32.totalorder %s2184_s26, 2  ;;  %s1717_s29 = sand.u32 1, %s2172_s23  }
 0x313   : > { %s1718_s19 = scalar_lea.sflag [#allocation4], %s1717_s29 }
 0x314   : > { %p2046_p1 = pnand %p2049_p5, %p2323_p6 }
 0x316   : > { %p2047_p2 = pneg %p2046_p1 }
 0x318   : > { %2167 = dma.done.wait (%p2047_p2), %s1718_s19, 128  }
 0x319   : > { %2169 = vsyncadd (%p2047_p2), %s1718_s19, 4294967168  ;;  %s2628_s26 = sld [smem:[#allocation7_spill]]  ;;  %s2631_s23 = smov %s2176_s24 }
 0x31a   : > { %s2629_s9 = sld [smem:[#allocation6_spill]] }
 0x31b   : > { %s2630_s25 = sld [smem:[#allocation8_spill]] }
 0x31f   : > { %p29_p3 = scmp.ge.s32.totalorder %s2628_s26, 6  }
 0x320   : > { %s2632_s24 = smov %s2629_s9 }
 0x321   :  { %31 = sbr.rel (!%p29_p3) target bundleno = 8 (0x8), region = 139 }
 0x326   :  { %1730 = vsyncpa [#allocation4], 1 }
 0x327   :  { %1732 = vsyncpa [#allocation4 + $0x1], 1 }

</bundles_post_ra>
